<compile_context>
chip_gen: v6e
topology: v6e:2x2x1
jax: 0.10.0
libtpu: 0.0.40
codegen_flags: <defaults>
</compile_context>

<pallas_src>
import math
import jax
import jax.numpy as jnp
import numpy as np
from jax.experimental import pallas as pl
from jax.experimental.pallas import tpu as pltpu

# ---------------- model hyper-parameters (small synthetic sizes) ----------------
B, H, W, CIN = 2, 16, 16, 3          # input images [B, 3, 16, 16] (NCHW)
PREV_DIM = 64                        # backbone.feature_info.channels()[-1]
NUM_CLASSES = 16                     # num_classes
NC_PAD = 128                         # class axis zero-padded to a lane-dense 128
DCHUNK = 16                          # feature-dim chunk (keeps feats vregs < 8)
S = 30.0
M = 0.5
COS_M = math.cos(M)
SIN_M = math.sin(M)
TH = math.cos(math.pi - M)           # easy_margin=False
MM = math.sin(math.pi - M) * M
EPS = 1e-12                          # F.normalize eps


def arcface_kernel(lab_ref, x_ref, wcomb_ref, out_ref):
    # lab_ref   : SMEM [B] int32                 labels (scalar-prefetched)
    # x_ref     : [CIN*B, HW] f32                channel-major flattened images
    # wcomb_ref : [PREV_DIM + 8, NC_PAD] f32     packed weights:
    #               rows [0:D)      -> normalized ArcFace weight, transposed, class-padded
    #               rows [D:D+CIN)  -> backbone 1x1 weight transposed, in lanes [0:D)
    # out_ref   : [B, NC_PAD] f32                lane-dense scaled margin logits
    x = x_ref[...]                                     # [CIN*B, HW]
    hw = x.shape[1]
    bsz = x.shape[0] // CIN
    inv_hw = 1.0 / hw

    # backbone 1x1 weight rows (tiny, lane-dense load; only lanes [0:D) are used)
    wbb_t = wcomb_ref[PREV_DIM:PREV_DIM + CIN, :]      # [CIN, NC_PAD]

    # Accumulators: sum(emb^2) and emb @ Wn^T, folded per D-chunk so the full
    # [B, D, HW] feats tensor (and even the full emb) is never live at once.
    ss_acc = jnp.zeros((bsz, 1), jnp.float32)
    dot_acc = jnp.zeros((bsz, NC_PAD), jnp.float32)

    for dc in range(0, PREV_DIM, DCHUNK):              # static unroll, 4 chunks
        # --- backbone stub: 1x1 conv as CIN broadcast-FMA passes (VPU) ---
        xc = x[0:bsz, :]                                           # [B, HW]
        wc = wbb_t[0:1, dc:dc + DCHUNK]                            # [1, DCHUNK]
        f = xc[:, None, :] * wc[:, :, None]                        # [B, DCHUNK, HW]
        for c in range(1, CIN):                                    # static unroll
            xc = x[c * bsz:(c + 1) * bsz, :]                       # contiguous rows
            wc = wbb_t[c:c + 1, dc:dc + DCHUNK]
            f = f + xc[:, None, :] * wc[:, :, None]
        f = jnp.maximum(f, 0.0)                                    # ReLU

        # --- neck 'Simple': AdaptiveAvgPool2d((1,1)) + Flatten == spatial mean ---
        emb_c = jnp.sum(f, axis=-1) * inv_hw                       # [B, DCHUNK]

        # --- fold chunk into norm + cos accumulators (MXU, aligned K-slice) ---
        ss_acc = ss_acc + jnp.sum(emb_c * emb_c, axis=-1, keepdims=True)
        dot_acc = dot_acc + jnp.dot(emb_c, wcomb_ref[dc:dc + DCHUNK, :],
                                    preferred_element_type=jnp.float32)

    # dropout: identity (eval-mode semantics)

    # F.normalize(x) then linear == (x @ Wn^T) scaled per-row by 1/max(||x||, eps);
    # exact sqrt + divide (not approx rsqrt) for parity with the reference.
    inv_n = 1.0 / jnp.maximum(jnp.sqrt(ss_acc), EPS)               # [B, 1]
    cos = jnp.clip(dot_acc * inv_n, -1.0, 1.0)                     # [B, NC_PAD]
    sin = jnp.sqrt(jnp.maximum(1.0 - cos * cos, 0.0))
    cos_m = jnp.where(cos > TH, cos * COS_M - sin * SIN_M, cos - MM)

    # one-hot margin select: build a [B,1] label column from SMEM scalars, then a
    # single broadcast compare (one full-width select, not one per batch row).
    col = jax.lax.broadcasted_iota(jnp.int32, cos.shape, 1)
    row1 = jax.lax.broadcasted_iota(jnp.int32, (bsz, 1), 0)
    lab_col = jnp.zeros((bsz, 1), jnp.int32)
    for b in range(bsz):                                           # static unroll, B=2
        lab_col = jnp.where(row1 == b, lab_ref[b], lab_col)

    out_ref[...] = jnp.where(col == lab_col, cos_m, cos) * S       # lane-dense store


def arcface_forward(x_nchw, w_bb_dc, w_arc, labels):
    """x_nchw: [B, CIN, H, W] f32; w_bb_dc: [PREV_DIM, CIN]; w_arc: [NC, PREV_DIM];
    labels: [B] int."""
    b, c, h, w = x_nchw.shape
    hw = h * w
    # channel-major flatten: row index = channel*B + batch, so each channel's rows
    # are a contiguous sublane slice inside the kernel (free wrapper-side transpose).
    x_cb = jnp.transpose(x_nchw, (1, 0, 2, 3)).reshape(c * b, hw)
    lab = labels.astype(jnp.int32)

    # ---- input-independent weight prep (per weight update, not per forward) ----
    # Row-normalize the ArcFace weight, transpose to [D, NC] so the in-kernel matmul
    # contracts (1,)x(0,) without an XLU transpose, zero-pad classes to 128 lanes so
    # the output store is lane-dense, and pack the backbone weight into the same
    # buffer so the kernel needs a single weight DMA.  (NUM_CLASSES <= 128 assumed;
    # larger class counts would grid over lane-dense class tiles instead.)
    wn = w_arc / jnp.maximum(jnp.linalg.norm(w_arc, axis=-1, keepdims=True), EPS)
    wn_t = jnp.zeros((PREV_DIM, NC_PAD), jnp.float32).at[:, :NUM_CLASSES].set(wn.T)
    wbb_rows = jnp.zeros((8, NC_PAD), jnp.float32).at[:c, :PREV_DIM].set(w_bb_dc.T)
    w_comb = jnp.concatenate([wn_t, wbb_rows], axis=0)             # [D+8, 128]

    out = pl.pallas_call(
        arcface_kernel,
        out_shape=jax.ShapeDtypeStruct((b, NC_PAD), jnp.float32),
        grid_spec=pltpu.PrefetchScalarGridSpec(
            num_scalar_prefetch=1,               # labels -> SMEM
            grid=(1,),
            in_specs=[
                pl.BlockSpec((c * b, hw), lambda i, lab: (0, 0)),
                pl.BlockSpec((PREV_DIM + 8, NC_PAD), lambda i, lab: (0, 0)),
            ],
            out_specs=pl.BlockSpec((b, NC_PAD), lambda i, lab: (0, 0)),
        ),
        compiler_params=pltpu.CompilerParams(
            dimension_semantics=("arbitrary",)),
    )(lab, x_cb, w_comb)
    return out[:, :NUM_CLASSES]


def reference_forward(x_nchw, w_bb_dc, w_arc, labels):
    """Pure-JAX reference mirroring the PyTorch semantics (synthetic backbone)."""
    b = x_nchw.shape[0]
    x = x_nchw.reshape(b, CIN, -1)                                    # [B, C, HW]
    feats = jnp.maximum(
        jnp.einsum("dc,bcs->bds", w_bb_dc, x,
                   precision=jax.lax.Precision.HIGHEST), 0.0)
    emb = jnp.mean(feats, axis=-1)                                    # [B, D]
    xn = emb / jnp.maximum(jnp.linalg.norm(emb, axis=-1, keepdims=True), EPS)
    wn = w_arc / jnp.maximum(jnp.linalg.norm(w_arc, axis=-1, keepdims=True), EPS)
    cos = jnp.clip(jnp.einsum("bd,nd->bn", xn, wn,
                              precision=jax.lax.Precision.HIGHEST), -1.0, 1.0)
    sin = jnp.sqrt(jnp.maximum(1.0 - cos * cos, 0.0))
    cos_m = jnp.where(cos > TH, cos * COS_M - sin * SIN_M, cos - MM)
    one_hot = jax.nn.one_hot(labels, NUM_CLASSES, dtype=jnp.float32)
    return (one_hot * cos_m + (1.0 - one_hot) * cos) * S


if __name__ == "__main__":
    key = jax.random.PRNGKey(0)
    k_x, k_bb, k_arc = jax.random.split(key, 3)

    # deterministic parameter init
    bound_bb = math.sqrt(6.0 / (CIN + PREV_DIM))             # xavier-uniform style
    w_bb = jax.random.uniform(k_bb, (PREV_DIM, CIN), jnp.float32,
                              minval=-bound_bb, maxval=bound_bb)
    bound_arc = math.sqrt(6.0 / (PREV_DIM + NUM_CLASSES))    # nn.init.xavier_uniform_
    w_arc = jax.random.uniform(k_arc, (NUM_CLASSES, PREV_DIM), jnp.float32,
                               minval=-bound_arc, maxval=bound_arc)

    # inputs (PyTorch NCHW convention)
    x = jax.random.normal(k_x, (B, CIN, H, W), jnp.float32)
    labels = jnp.arange(B, dtype=jnp.int32) % NUM_CLASSES

    out = arcface_forward(x, w_bb, w_arc, labels)
    out = jax.block_until_ready(out)

    ref = reference_forward(x, w_bb, w_arc, labels)
    np.testing.assert_allclose(np.asarray(out), np.asarray(ref),
                               rtol=2e-2, atol=2e-2)
    assert out.shape == (B, NUM_CLASSES)
    print("KERNEL_OK")
</pallas_src>

<mosaic_0001>
module attributes {stable_mosaic.version = 11 : i64} {
  func.func @arcface_kernel(%arg0: i32, %arg1: memref<2xi32, #tpu.memory_space<smem>>, %arg2: memref<6x256xf32, #tpu.memory_space<vmem>>, %arg3: memref<72x128xf32, #tpu.memory_space<vmem>>, %arg4: memref<2x128xf32, #tpu.memory_space<vmem>>) attributes {dimension_semantics = [#tpu.dimension_semantics<arbitrary>], iteration_bounds = array<i64: 1>, scalar_prefetch = 1 : i64, scratch_operands = 0 : i64, tpu.core_type = #tpu.core_type<tc>, window_params = [{pipeline_mode = #tpu.pipeline_mode<synchronous>, transform_indices = @transform_0, window_bounds = array<i64: 6, 256>}, {pipeline_mode = #tpu.pipeline_mode<synchronous>, transform_indices = @transform_1, window_bounds = array<i64: 72, 128>}, {pipeline_mode = #tpu.pipeline_mode<synchronous>, transform_indices = @transform_2, window_bounds = array<i64: 2, 128>}]} {
    %c0 = arith.constant 0 : index
    %c0_0 = arith.constant 0 : index
    %0 = vector.load %arg2[%c0, %c0_0] : memref<6x256xf32, #tpu.memory_space<vmem>>, vector<6x256xf32>
    %c64 = arith.constant 64 : index
    %c0_1 = arith.constant 0 : index
    %1 = vector.load %arg3[%c64, %c0_1] : memref<72x128xf32, #tpu.memory_space<vmem>>, vector<3x128xf32>
    %cst = arith.constant 0.000000e+00 : f32
    %2 = vector.broadcast %cst : f32 to vector<2x1xf32>
    %cst_2 = arith.constant 0.000000e+00 : f32
    %3 = vector.broadcast %cst_2 : f32 to vector<2x128xf32>
    %4 = vector.extract_strided_slice %0 {offsets = [0, 0], sizes = [2, 256], strides = [1, 1]} : vector<6x256xf32> to vector<2x256xf32>
    %5 = vector.extract_strided_slice %1 {offsets = [0, 0], sizes = [1, 16], strides = [1, 1]} : vector<3x128xf32> to vector<1x16xf32>
    %6 = vector.shape_cast %4 : vector<2x256xf32> to vector<2x1x256xf32>
    %7 = vector.shape_cast %5 : vector<1x16xf32> to vector<1x16x1xf32>
    %8 = vector.broadcast %6 : vector<2x1x256xf32> to vector<2x16x256xf32>
    %9 = vector.broadcast %7 : vector<1x16x1xf32> to vector<2x16x256xf32>
    %10 = arith.mulf %8, %9 : vector<2x16x256xf32>
    %11 = vector.extract_strided_slice %0 {offsets = [2, 0], sizes = [2, 256], strides = [1, 1]} : vector<6x256xf32> to vector<2x256xf32>
    %12 = vector.extract_strided_slice %1 {offsets = [1, 0], sizes = [1, 16], strides = [1, 1]} : vector<3x128xf32> to vector<1x16xf32>
    %13 = vector.shape_cast %11 : vector<2x256xf32> to vector<2x1x256xf32>
    %14 = vector.shape_cast %12 : vector<1x16xf32> to vector<1x16x1xf32>
    %15 = vector.broadcast %13 : vector<2x1x256xf32> to vector<2x16x256xf32>
    %16 = vector.broadcast %14 : vector<1x16x1xf32> to vector<2x16x256xf32>
    %17 = arith.mulf %15, %16 : vector<2x16x256xf32>
    %18 = arith.addf %10, %17 : vector<2x16x256xf32>
    %19 = vector.extract_strided_slice %0 {offsets = [4, 0], sizes = [2, 256], strides = [1, 1]} : vector<6x256xf32> to vector<2x256xf32>
    %20 = vector.extract_strided_slice %1 {offsets = [2, 0], sizes = [1, 16], strides = [1, 1]} : vector<3x128xf32> to vector<1x16xf32>
    %21 = vector.shape_cast %19 : vector<2x256xf32> to vector<2x1x256xf32>
    %22 = vector.shape_cast %20 : vector<1x16xf32> to vector<1x16x1xf32>
    %23 = vector.broadcast %21 : vector<2x1x256xf32> to vector<2x16x256xf32>
    %24 = vector.broadcast %22 : vector<1x16x1xf32> to vector<2x16x256xf32>
    %25 = arith.mulf %23, %24 : vector<2x16x256xf32>
    %26 = arith.addf %18, %25 : vector<2x16x256xf32>
    %cst_3 = arith.constant 0.000000e+00 : f32
    %27 = vector.broadcast %cst_3 : f32 to vector<2x16x256xf32>
    %28 = arith.maximumf %26, %27 : vector<2x16x256xf32>
    %cst_4 = arith.constant dense<0.000000e+00> : vector<2x16xf32>
    %29 = vector.multi_reduction <add>, %28, %cst_4 [2] : vector<2x16x256xf32> to vector<2x16xf32>
    %cst_5 = arith.constant 3.906250e-03 : f32
    %30 = vector.broadcast %cst_5 : f32 to vector<2x16xf32>
    %31 = arith.mulf %29, %30 : vector<2x16xf32>
    %32 = arith.mulf %31, %31 : vector<2x16xf32>
    %cst_6 = arith.constant dense<0.000000e+00> : vector<2xf32>
    %33 = vector.multi_reduction <add>, %32, %cst_6 [1] : vector<2x16xf32> to vector<2xf32>
    %34 = vector.shape_cast %33 : vector<2xf32> to vector<2x1xf32>
    %35 = arith.addf %2, %34 : vector<2x1xf32>
    %c0_7 = arith.constant 0 : index
    %c0_8 = arith.constant 0 : index
    %36 = vector.load %arg3[%c0_7, %c0_8] : memref<72x128xf32, #tpu.memory_space<vmem>>, vector<16x128xf32>
    %cst_9 = arith.constant dense<0.000000e+00> : vector<2x128xf32>
    %37 = tpu.matmul %31, %36, %cst_9 {dimension_numbers = #tpu.dot_dimension_numbers<[1], [0], [0], [1], [0, 0, 1, 1], [], []>} : vector<2x16xf32>, vector<16x128xf32>, vector<2x128xf32> -> vector<2x128xf32>
    %38 = arith.addf %3, %37 : vector<2x128xf32>
    %39 = vector.extract_strided_slice %0 {offsets = [0, 0], sizes = [2, 256], strides = [1, 1]} : vector<6x256xf32> to vector<2x256xf32>
    %40 = vector.extract_strided_slice %1 {offsets = [0, 16], sizes = [1, 16], strides = [1, 1]} : vector<3x128xf32> to vector<1x16xf32>
    %41 = vector.shape_cast %39 : vector<2x256xf32> to vector<2x1x256xf32>
    %42 = vector.shape_cast %40 : vector<1x16xf32> to vector<1x16x1xf32>
    %43 = vector.broadcast %41 : vector<2x1x256xf32> to vector<2x16x256xf32>
    %44 = vector.broadcast %42 : vector<1x16x1xf32> to vector<2x16x256xf32>
    %45 = arith.mulf %43, %44 : vector<2x16x256xf32>
    %46 = vector.extract_strided_slice %0 {offsets = [2, 0], sizes = [2, 256], strides = [1, 1]} : vector<6x256xf32> to vector<2x256xf32>
    %47 = vector.extract_strided_slice %1 {offsets = [1, 16], sizes = [1, 16], strides = [1, 1]} : vector<3x128xf32> to vector<1x16xf32>
    %48 = vector.shape_cast %46 : vector<2x256xf32> to vector<2x1x256xf32>
    %49 = vector.shape_cast %47 : vector<1x16xf32> to vector<1x16x1xf32>
    %50 = vector.broadcast %48 : vector<2x1x256xf32> to vector<2x16x256xf32>
    %51 = vector.broadcast %49 : vector<1x16x1xf32> to vector<2x16x256xf32>
    %52 = arith.mulf %50, %51 : vector<2x16x256xf32>
    %53 = arith.addf %45, %52 : vector<2x16x256xf32>
    %54 = vector.extract_strided_slice %0 {offsets = [4, 0], sizes = [2, 256], strides = [1, 1]} : vector<6x256xf32> to vector<2x256xf32>
    %55 = vector.extract_strided_slice %1 {offsets = [2, 16], sizes = [1, 16], strides = [1, 1]} : vector<3x128xf32> to vector<1x16xf32>
    %56 = vector.shape_cast %54 : vector<2x256xf32> to vector<2x1x256xf32>
    %57 = vector.shape_cast %55 : vector<1x16xf32> to vector<1x16x1xf32>
    %58 = vector.broadcast %56 : vector<2x1x256xf32> to vector<2x16x256xf32>
    %59 = vector.broadcast %57 : vector<1x16x1xf32> to vector<2x16x256xf32>
    %60 = arith.mulf %58, %59 : vector<2x16x256xf32>
    %61 = arith.addf %53, %60 : vector<2x16x256xf32>
    %cst_10 = arith.constant 0.000000e+00 : f32
    %62 = vector.broadcast %cst_10 : f32 to vector<2x16x256xf32>
    %63 = arith.maximumf %61, %62 : vector<2x16x256xf32>
    %cst_11 = arith.constant dense<0.000000e+00> : vector<2x16xf32>
    %64 = vector.multi_reduction <add>, %63, %cst_11 [2] : vector<2x16x256xf32> to vector<2x16xf32>
    %cst_12 = arith.constant 3.906250e-03 : f32
    %65 = vector.broadcast %cst_12 : f32 to vector<2x16xf32>
    %66 = arith.mulf %64, %65 : vector<2x16xf32>
    %67 = arith.mulf %66, %66 : vector<2x16xf32>
    %cst_13 = arith.constant dense<0.000000e+00> : vector<2xf32>
    %68 = vector.multi_reduction <add>, %67, %cst_13 [1] : vector<2x16xf32> to vector<2xf32>
    %69 = vector.shape_cast %68 : vector<2xf32> to vector<2x1xf32>
    %70 = arith.addf %35, %69 : vector<2x1xf32>
    %c16 = arith.constant 16 : index
    %c0_14 = arith.constant 0 : index
    %71 = vector.load %arg3[%c16, %c0_14] : memref<72x128xf32, #tpu.memory_space<vmem>>, vector<16x128xf32>
    %cst_15 = arith.constant dense<0.000000e+00> : vector<2x128xf32>
    %72 = tpu.matmul %66, %71, %cst_15 {dimension_numbers = #tpu.dot_dimension_numbers<[1], [0], [0], [1], [0, 0, 1, 1], [], []>} : vector<2x16xf32>, vector<16x128xf32>, vector<2x128xf32> -> vector<2x128xf32>
    %73 = arith.addf %38, %72 : vector<2x128xf32>
    %74 = vector.extract_strided_slice %0 {offsets = [0, 0], sizes = [2, 256], strides = [1, 1]} : vector<6x256xf32> to vector<2x256xf32>
    %75 = vector.extract_strided_slice %1 {offsets = [0, 32], sizes = [1, 16], strides = [1, 1]} : vector<3x128xf32> to vector<1x16xf32>
    %76 = vector.shape_cast %74 : vector<2x256xf32> to vector<2x1x256xf32>
    %77 = vector.shape_cast %75 : vector<1x16xf32> to vector<1x16x1xf32>
    %78 = vector.broadcast %76 : vector<2x1x256xf32> to vector<2x16x256xf32>
    %79 = vector.broadcast %77 : vector<1x16x1xf32> to vector<2x16x256xf32>
    %80 = arith.mulf %78, %79 : vector<2x16x256xf32>
    %81 = vector.extract_strided_slice %0 {offsets = [2, 0], sizes = [2, 256], strides = [1, 1]} : vector<6x256xf32> to vector<2x256xf32>
    %82 = vector.extract_strided_slice %1 {offsets = [1, 32], sizes = [1, 16], strides = [1, 1]} : vector<3x128xf32> to vector<1x16xf32>
    %83 = vector.shape_cast %81 : vector<2x256xf32> to vector<2x1x256xf32>
    %84 = vector.shape_cast %82 : vector<1x16xf32> to vector<1x16x1xf32>
    %85 = vector.broadcast %83 : vector<2x1x256xf32> to vector<2x16x256xf32>
    %86 = vector.broadcast %84 : vector<1x16x1xf32> to vector<2x16x256xf32>
    %87 = arith.mulf %85, %86 : vector<2x16x256xf32>
    %88 = arith.addf %80, %87 : vector<2x16x256xf32>
    %89 = vector.extract_strided_slice %0 {offsets = [4, 0], sizes = [2, 256], strides = [1, 1]} : vector<6x256xf32> to vector<2x256xf32>
    %90 = vector.extract_strided_slice %1 {offsets = [2, 32], sizes = [1, 16], strides = [1, 1]} : vector<3x128xf32> to vector<1x16xf32>
    %91 = vector.shape_cast %89 : vector<2x256xf32> to vector<2x1x256xf32>
    %92 = vector.shape_cast %90 : vector<1x16xf32> to vector<1x16x1xf32>
    %93 = vector.broadcast %91 : vector<2x1x256xf32> to vector<2x16x256xf32>
    %94 = vector.broadcast %92 : vector<1x16x1xf32> to vector<2x16x256xf32>
    %95 = arith.mulf %93, %94 : vector<2x16x256xf32>
    %96 = arith.addf %88, %95 : vector<2x16x256xf32>
    %cst_16 = arith.constant 0.000000e+00 : f32
    %97 = vector.broadcast %cst_16 : f32 to vector<2x16x256xf32>
    %98 = arith.maximumf %96, %97 : vector<2x16x256xf32>
    %cst_17 = arith.constant dense<0.000000e+00> : vector<2x16xf32>
    %99 = vector.multi_reduction <add>, %98, %cst_17 [2] : vector<2x16x256xf32> to vector<2x16xf32>
    %cst_18 = arith.constant 3.906250e-03 : f32
    %100 = vector.broadcast %cst_18 : f32 to vector<2x16xf32>
    %101 = arith.mulf %99, %100 : vector<2x16xf32>
    %102 = arith.mulf %101, %101 : vector<2x16xf32>
    %cst_19 = arith.constant dense<0.000000e+00> : vector<2xf32>
    %103 = vector.multi_reduction <add>, %102, %cst_19 [1] : vector<2x16xf32> to vector<2xf32>
    %104 = vector.shape_cast %103 : vector<2xf32> to vector<2x1xf32>
    %105 = arith.addf %70, %104 : vector<2x1xf32>
    %c32 = arith.constant 32 : index
    %c0_20 = arith.constant 0 : index
    %106 = vector.load %arg3[%c32, %c0_20] : memref<72x128xf32, #tpu.memory_space<vmem>>, vector<16x128xf32>
    %cst_21 = arith.constant dense<0.000000e+00> : vector<2x128xf32>
    %107 = tpu.matmul %101, %106, %cst_21 {dimension_numbers = #tpu.dot_dimension_numbers<[1], [0], [0], [1], [0, 0, 1, 1], [], []>} : vector<2x16xf32>, vector<16x128xf32>, vector<2x128xf32> -> vector<2x128xf32>
    %108 = arith.addf %73, %107 : vector<2x128xf32>
    %109 = vector.extract_strided_slice %0 {offsets = [0, 0], sizes = [2, 256], strides = [1, 1]} : vector<6x256xf32> to vector<2x256xf32>
    %110 = vector.extract_strided_slice %1 {offsets = [0, 48], sizes = [1, 16], strides = [1, 1]} : vector<3x128xf32> to vector<1x16xf32>
    %111 = vector.shape_cast %109 : vector<2x256xf32> to vector<2x1x256xf32>
    %112 = vector.shape_cast %110 : vector<1x16xf32> to vector<1x16x1xf32>
    %113 = vector.broadcast %111 : vector<2x1x256xf32> to vector<2x16x256xf32>
    %114 = vector.broadcast %112 : vector<1x16x1xf32> to vector<2x16x256xf32>
    %115 = arith.mulf %113, %114 : vector<2x16x256xf32>
    %116 = vector.extract_strided_slice %0 {offsets = [2, 0], sizes = [2, 256], strides = [1, 1]} : vector<6x256xf32> to vector<2x256xf32>
    %117 = vector.extract_strided_slice %1 {offsets = [1, 48], sizes = [1, 16], strides = [1, 1]} : vector<3x128xf32> to vector<1x16xf32>
    %118 = vector.shape_cast %116 : vector<2x256xf32> to vector<2x1x256xf32>
    %119 = vector.shape_cast %117 : vector<1x16xf32> to vector<1x16x1xf32>
    %120 = vector.broadcast %118 : vector<2x1x256xf32> to vector<2x16x256xf32>
    %121 = vector.broadcast %119 : vector<1x16x1xf32> to vector<2x16x256xf32>
    %122 = arith.mulf %120, %121 : vector<2x16x256xf32>
    %123 = arith.addf %115, %122 : vector<2x16x256xf32>
    %124 = vector.extract_strided_slice %0 {offsets = [4, 0], sizes = [2, 256], strides = [1, 1]} : vector<6x256xf32> to vector<2x256xf32>
    %125 = vector.extract_strided_slice %1 {offsets = [2, 48], sizes = [1, 16], strides = [1, 1]} : vector<3x128xf32> to vector<1x16xf32>
    %126 = vector.shape_cast %124 : vector<2x256xf32> to vector<2x1x256xf32>
    %127 = vector.shape_cast %125 : vector<1x16xf32> to vector<1x16x1xf32>
    %128 = vector.broadcast %126 : vector<2x1x256xf32> to vector<2x16x256xf32>
    %129 = vector.broadcast %127 : vector<1x16x1xf32> to vector<2x16x256xf32>
    %130 = arith.mulf %128, %129 : vector<2x16x256xf32>
    %131 = arith.addf %123, %130 : vector<2x16x256xf32>
    %cst_22 = arith.constant 0.000000e+00 : f32
    %132 = vector.broadcast %cst_22 : f32 to vector<2x16x256xf32>
    %133 = arith.maximumf %131, %132 : vector<2x16x256xf32>
    %cst_23 = arith.constant dense<0.000000e+00> : vector<2x16xf32>
    %134 = vector.multi_reduction <add>, %133, %cst_23 [2] : vector<2x16x256xf32> to vector<2x16xf32>
    %cst_24 = arith.constant 3.906250e-03 : f32
    %135 = vector.broadcast %cst_24 : f32 to vector<2x16xf32>
    %136 = arith.mulf %134, %135 : vector<2x16xf32>
    %137 = arith.mulf %136, %136 : vector<2x16xf32>
    %cst_25 = arith.constant dense<0.000000e+00> : vector<2xf32>
    %138 = vector.multi_reduction <add>, %137, %cst_25 [1] : vector<2x16xf32> to vector<2xf32>
    %139 = vector.shape_cast %138 : vector<2xf32> to vector<2x1xf32>
    %140 = arith.addf %105, %139 : vector<2x1xf32>
    %c48 = arith.constant 48 : index
    %c0_26 = arith.constant 0 : index
    %141 = vector.load %arg3[%c48, %c0_26] : memref<72x128xf32, #tpu.memory_space<vmem>>, vector<16x128xf32>
    %cst_27 = arith.constant dense<0.000000e+00> : vector<2x128xf32>
    %142 = tpu.matmul %136, %141, %cst_27 {dimension_numbers = #tpu.dot_dimension_numbers<[1], [0], [0], [1], [0, 0, 1, 1], [], []>} : vector<2x16xf32>, vector<16x128xf32>, vector<2x128xf32> -> vector<2x128xf32>
    %143 = arith.addf %108, %142 : vector<2x128xf32>
    %144 = math.sqrt %140 : vector<2x1xf32>
    %cst_28 = arith.constant 9.99999996E-13 : f32
    %145 = vector.broadcast %cst_28 : f32 to vector<2x1xf32>
    %146 = arith.maximumf %144, %145 : vector<2x1xf32>
    %cst_29 = arith.constant 1.000000e+00 : f32
    %147 = vector.broadcast %cst_29 : f32 to vector<2x1xf32>
    %148 = arith.divf %147, %146 : vector<2x1xf32>
    %149 = vector.broadcast %148 : vector<2x1xf32> to vector<2x128xf32>
    %150 = arith.mulf %143, %149 : vector<2x128xf32>
    %cst_30 = arith.constant -1.000000e+00 : f32
    %cst_31 = arith.constant 1.000000e+00 : f32
    %151 = vector.broadcast %cst_30 : f32 to vector<2x128xf32>
    %152 = arith.maximumf %151, %150 : vector<2x128xf32>
    %153 = vector.broadcast %cst_31 : f32 to vector<2x128xf32>
    %154 = arith.minimumf %153, %152 : vector<2x128xf32>
    %155 = arith.mulf %154, %154 : vector<2x128xf32>
    %cst_32 = arith.constant 1.000000e+00 : f32
    %156 = vector.broadcast %cst_32 : f32 to vector<2x128xf32>
    %157 = arith.subf %156, %155 : vector<2x128xf32>
    %cst_33 = arith.constant 0.000000e+00 : f32
    %158 = vector.broadcast %cst_33 : f32 to vector<2x128xf32>
    %159 = arith.maximumf %157, %158 : vector<2x128xf32>
    %160 = math.sqrt %159 : vector<2x128xf32>
    %cst_34 = arith.constant -0.87758255 : f32
    %161 = vector.broadcast %cst_34 : f32 to vector<2x128xf32>
    %162 = arith.cmpf ogt, %154, %161 : vector<2x128xf32>
    %cst_35 = arith.constant 0.87758255 : f32
    %163 = vector.broadcast %cst_35 : f32 to vector<2x128xf32>
    %164 = arith.mulf %154, %163 : vector<2x128xf32>
    %cst_36 = arith.constant 0.47942555 : f32
    %165 = vector.broadcast %cst_36 : f32 to vector<2x128xf32>
    %166 = arith.mulf %160, %165 : vector<2x128xf32>
    %167 = arith.subf %164, %166 : vector<2x128xf32>
    %cst_37 = arith.constant 0.239712775 : f32
    %168 = vector.broadcast %cst_37 : f32 to vector<2x128xf32>
    %169 = arith.subf %154, %168 : vector<2x128xf32>
    %170 = arith.select %162, %167, %169 : vector<2x128xi1>, vector<2x128xf32>
    %171 = tpu.iota {dimensions = array<i32: 1>} : vector<2x128xi32>
    %172 = tpu.iota {dimensions = array<i32: 0>} : vector<2x1xi32>
    %c0_i32 = arith.constant 0 : i32
    %173 = vector.broadcast %c0_i32 : i32 to vector<2x1xi32>
    %c0_i32_38 = arith.constant 0 : i32
    %174 = vector.broadcast %c0_i32_38 : i32 to vector<2x1xi32>
    %175 = arith.cmpi eq, %172, %174 : vector<2x1xi32>
    %c0_39 = arith.constant 0 : index
    %176 = memref.load %arg1[%c0_39] : memref<2xi32, #tpu.memory_space<smem>>
    %177 = vector.broadcast %176 : i32 to vector<2x1xi32>
    %178 = arith.select %175, %177, %173 : vector<2x1xi1>, vector<2x1xi32>
    %c1_i32 = arith.constant 1 : i32
    %179 = vector.broadcast %c1_i32 : i32 to vector<2x1xi32>
    %180 = arith.cmpi eq, %172, %179 : vector<2x1xi32>
    %c1 = arith.constant 1 : index
    %181 = memref.load %arg1[%c1] : memref<2xi32, #tpu.memory_space<smem>>
    %182 = vector.broadcast %181 : i32 to vector<2x1xi32>
    %183 = arith.select %180, %182, %178 : vector<2x1xi1>, vector<2x1xi32>
    %184 = vector.broadcast %183 : vector<2x1xi32> to vector<2x128xi32>
    %185 = arith.cmpi eq, %171, %184 : vector<2x128xi32>
    %186 = arith.select %185, %170, %154 : vector<2x128xi1>, vector<2x128xf32>
    %cst_40 = arith.constant 3.000000e+01 : f32
    %187 = vector.broadcast %cst_40 : f32 to vector<2x128xf32>
    %188 = arith.mulf %186, %187 : vector<2x128xf32>
    %c0_41 = arith.constant 0 : index
    %c0_42 = arith.constant 0 : index
    %189 = vector.load %arg4[%c0_41, %c0_42] : memref<2x128xf32, #tpu.memory_space<vmem>>, vector<2x128xf32>
    tpu.vector_store %arg4[%c0_41, %c0_42], %188 {strides = array<i32>} : memref<2x128xf32, #tpu.memory_space<vmem>>, vector<2x128xf32>,
    return
  }
  func.func @transform_0(%arg0: i32, %arg1: memref<2xi32, #tpu.memory_space<smem>>) -> (i32, i32) {
    %c0_i32 = arith.constant 0 : i32
    %c0_i32_0 = arith.constant 0 : i32
    %c0_i32_1 = arith.constant 0 : i32
    return %c0_i32, %c0_i32_0 : i32, i32
  }
  func.func @transform_1(%arg0: i32, %arg1: memref<2xi32, #tpu.memory_space<smem>>) -> (i32, i32) {
    %c0_i32 = arith.constant 0 : i32
    %c0_i32_0 = arith.constant 0 : i32
    %c0_i32_1 = arith.constant 0 : i32
    return %c0_i32, %c0_i32_0 : i32, i32
  }
  func.func @transform_2(%arg0: i32, %arg1: memref<2xi32, #tpu.memory_space<smem>>) -> (i32, i32) {
    %c0_i32 = arith.constant 0 : i32
    %c0_i32_0 = arith.constant 0 : i32
    %c0_i32_1 = arith.constant 0 : i32
    return %c0_i32, %c0_i32_0 : i32, i32
  }
}

</mosaic_0001>

<bundles_post_ra>
// kernel: tpu_custom_call.1
= control target key start
LH: loop header
LB: loop body
LE: loop exit
PB: predicated region body
PF: predicated region fallthrough
CT: control target
= control target key end

     0   :  { %s1242_s12 = smov [#allocation3]   ;;  %s1579_s0 = inlined_call_operand.hbm [shape: s32[2], index: 0, kind: input, shape index: {}]   ;;  %s1580_s1 = inlined_call_operand.hbm [shape: f32[6,256], index: 1, kind: input, shape index: {}]   ;;  %s1581_s2 = inlined_call_operand.hbm [shape: f32[72,128], index: 2, kind: input, shape index: {}]   ;;  %s1582_s3 = inlined_call_operand.hbm [shape: f32[2,128], index: 3, kind: output, shape index: {}]  }
   0x1   :  { %9 = dma.hbm_to_smem %s1579_s0, 16, %s1242_s12, [#allocation2] }
   0x2   :  { %1234 = dma.done.wait [#allocation2], 16 }
   0x3   :  { %1235 = vsyncadd [#allocation2], 4294967280 }
   0x4   :  { %11 = sfence }
   0x5   :  { %12 = vsyncpa [#allocation5], 0 }
   0x6   :  { %13 = vsyncpa [#allocation8], 0 }
   0x7   :  { %14 = vsyncpa [#allocation6], 0  ;;  %s1243_s15 = smov [#allocation4]   ;;  %s1244_s17 = smov [#allocation7]  }
   0x8   :  { %s21_s16 = sshll.u32 %s1243_s15, 4  ;;  %s30_s18 = sshll.u32 %s1244_s17, 4  ;;  %s22_s16 = int_to_ptr.vmem [resolvable:$true] %s21_s16  ;;  %s31_s18 = int_to_ptr.vmem [resolvable:$true] %s30_s18 }
   0x9   :  { %s1182_s19 = scalar_lea.vmem %s22_s16, 256  ;;  %p1187_p1 = scmp.lt.s32.totalorder %s22_s16, %s22_s16 }
   0xa   :  { %p1183_p0 = scmp.ne.s32.totalorder %s22_s16, %s1182_s19  ;;  %p1188_p2 = scmp.lt.s32.totalorder %s1182_s19, %s1182_s19 }
   0xc   :  { %p1189_p3 = por %p1188_p2, %p1187_p1 }
   0xe   :  { %p1190_p4 = pnand %p1189_p3, %p1183_p0 }
  0x10   :  { %1193 = shalt.err (!%p1190_p4)
}
  0x11   :  { %24 = dma.hbm_to_vmem [thread:$0]  %s1580_s1, 256, %s22_s16, [#allocation5]  }
  0x12   :  { %s1202_s21 = scalar_lea.vmem %s31_s18, 1152  ;;  %p1207_p6 = scmp.lt.s32.totalorder %s31_s18, %s31_s18 }
  0x13   :  { %p1203_p5 = scmp.ne.s32.totalorder %s31_s18, %s1202_s21  ;;  %p1208_p7 = scmp.lt.s32.totalorder %s1202_s21, %s1202_s21 }
  0x15   :  { %p1209_p8 = por %p1208_p7, %p1207_p6 }
  0x17   :  { %p1210_p9 = pnand %p1209_p8, %p1203_p5 }
  0x19   :  { %1213 = shalt.err (!%p1210_p9)
}
  0x1a   :  { %s1245_s22 = smov 128   ;;  %s1246_s23 = smov 8  }
  0x1b   :  { %36 = dma.hbm_to_vmem [thread:$0]  %s1581_s2, 1152, %s31_s18, [#allocation8], %s1245_s22, %s1245_s22, %s1246_s23  }
  0x1c   :  { %1236 = dma.done.wait [#allocation5], 256  }
  0x1d   :  { %1237 = vsyncadd [#allocation5], 4294967040 }
  0x1e   :  { %1238 = dma.done.wait [#allocation8], 1152  }
  0x1f   :  { %1239 = vsyncadd [#allocation8], 4294966144  ;;  %v52_v0 = vlaneseq  ;;  %v45_v4 = vld [vmem:[#allocation7 + $0x40] sm:$0x7]  ;;  %v1247_v9 = vmov 1966171168  }
  0x20   :  { %v50_v10 = vunpack.c.l.s4 %v1247_v9  ;;  %v1157_v13 = vld [vmem:[#allocation4] ss:$8 sps:$4 sm:$0xff]   ;;  %v1159_v17 = vld [vmem:[#allocation4 + $0x4] ss:$8 sps:$4 sm:$0x33]   ;;  %vm1249_vm0 = vmmov 0  }
  0x21   :  { %v1281_v1 = vshrl.u32 %v52_v0, 7  ;;  %vm272_vm1 = vcmask 130112   ;;  %vm283_vm2 = vcmask 1041409   ;;  %vm438_vm3 = vcmask 130048   ;;  %s1074_s1 = sld [smem:[#allocation3]]  ;;  %s1250_s26 = smov [#allocation9]  }
  0x22   :  { %v51_v11 = vunpack.c.0.s8 %v50_v10  ;;  %vm286_vm4 = vcmask 123904   ;;  %s1107_s2 = sld [smem:[#allocation3 + $0x1]]  ;;  %s1091_s27 = sshll.u32 %s1250_s26, 4  ;;  %s1092_s27 = int_to_ptr.vmem [resolvable:$true] %s1091_s27 }
  0x23   :  { %v1284_v2 = vsub.s32 1, %v1281_v1  ;;  %v1287_v3 = vsub.s32 0, %v1281_v1  ;;  %v184_v7 = vsub.s32 2, %v1281_v1  ;;  %vm1073_vm7 = vcmp.eq.s32.totalorder %v1281_v1, 0  ;;  %s1214_s28 = scalar_lea.vmem %s1092_s27, 32  ;;  %p1219_p11 = scmp.lt.s32.totalorder %s1092_s27, %s1092_s27 }
  0x24   :  { %v54_v12 = vsub.s32 %v51_v11, %v1281_v1  ;;  %vm1077_vm8 = vcmp.eq.s32.totalorder %v1281_v1, 1  ;;  %p1215_p10 = scmp.ne.s32.totalorder %s1092_s27, %s1214_s28  ;;  %p1220_p12 = scmp.lt.s32.totalorder %s1214_s28, %s1214_s28 }
  0x25   :  { %v115_v5 = vrot.slane %v45_v4, %v1284_v2  ;;  %v74_v6 = vrot.slane %v45_v4, %v1287_v3  ;;  %v185_v8 = vrot.slane %v45_v4, %v184_v7 }
  0x26   :  { %v55_v14 = vrot.slane %v1157_v13, %v54_v12  ;;  %v166_v20 = vrot.slane %v1159_v17, %v54_v12  ;;  %p1221_p13 = por %p1220_p12, %p1219_p11 }
  0x27   :  { %311 = vbcast.lane.b32.xlu1 %v115_v5, 272  ;;  %295 = vbcast.lane.b32.xlu0 %v74_v6, 272 }
  0x28   :  { %v56_v15 = vcombine.high %v55_v14, %v55_v14  ;;  %v63_v16 = vrot.slane %v55_v14, %v54_v12  ;;  %v167_v24 = vcombine.high %v166_v20, %v166_v20  ;;  %v174_v35 = vrot.slane %v166_v20, %v54_v12  ;;  %p1222_p0 = pnand %p1221_p13, %p1215_p10 }
  0x2a   :  { %v70_v18 = vrot.slane %v56_v15, %v54_v12  ;;  %v110_v19 = vcombine.high %v63_v16, %v63_v16  ;;  %v1306_v29 = vrot.slane %v63_v16, %v1287_v3  ;;  %v1309_v30 = vrot.slane %v63_v16, %v1284_v2 }
  0x2b   :  { %315 = vbcast.lane.b32.xlu1 %v115_v5, 280  ;;  %299 = vbcast.lane.b32.xlu0 %v74_v6, 280  ;;  %v181_v36 = vrot.slane %v167_v24, %v54_v12  ;;  %v1334_v55 = vrot.slane %v174_v35, %v1287_v3  ;;  %v1337_v56 = vrot.slane %v174_v35, %v1284_v2 }
  0x2c   :  { %v111_v21 = vcombine.high %v70_v18, %v70_v18  ;;  %v1294_v22 = vrot.slane %v110_v19, %v1287_v3  ;;  %v1297_v23 = vrot.slane %v110_v19, %v1284_v2  ;;  %v1312_v31 = vrot.slane %v70_v18, %v1287_v3 }
  0x2d   :  { %v1315_v32 = vrot.slane %v70_v18, %v1284_v2  ;;  %v1340_v57 = vrot.slane %v181_v36, %v1287_v3  ;;  %v1343_v58 = vrot.slane %v181_v36, %v1284_v2 }
  0x2e   :  { %v1300_v26 = vrot.slane %v111_v21, %v1287_v3  ;;  %v1303_v27 = vrot.slane %v111_v21, %v1284_v2 }
  0x2f   :  { %80 = vbcast.lane.b32.xlu1 %v74_v6, 264  ;;  %76 = vbcast.lane.b32.xlu0 %v74_v6, 256 }
  0x33   :  { %121 = vbcast.lane.b32.xlu1 %v115_v5, 264  ;;  %117 = vbcast.lane.b32.xlu0 %v115_v5, 256 }
  0x37   :  { %339 = vbcast.lane.b32.xlu1 %v185_v8, 280  ;;  %335 = vbcast.lane.b32.xlu0 %v185_v8, 272 }
  0x3b   :  { %191 = vbcast.lane.b32.xlu1 %v185_v8, 264  ;;  %187 = vbcast.lane.b32.xlu0 %v185_v8, 256 }
  0x3f   :  { %612 = vbcast.lane.b32.xlu1 %v74_v6, 296  ;;  %608 = vbcast.lane.b32.xlu0 %v74_v6, 288 }
  0x43   :  { %628 = vbcast.lane.b32.xlu1 %v115_v5, 296  ;;  %624 = vbcast.lane.b32.xlu0 %v115_v5, 288 }
  0x47   :  { %652 = vbcast.lane.b32.xlu1 %v185_v8, 296  ;;  %648 = vbcast.lane.b32.xlu0 %v185_v8, 288 }
  0x4b   :  { %830 = vbcast.lane.b32.xlu1 %v74_v6, 312  ;;  %826 = vbcast.lane.b32.xlu0 %v74_v6, 304 }
  0x4f   :  { %846 = vbcast.lane.b32.xlu1 %v115_v5, 312  ;;  %842 = vbcast.lane.b32.xlu0 %v115_v5, 304 }
  0x53   :  { %870 = vbcast.lane.b32.xlu1 %v185_v8, 312  ;;  %866 = vbcast.lane.b32.xlu0 %v185_v8, 304 }
  0x99   :  { %v312_v25 = vpop.permute.xlu1 %311  ;;  %v296_v28 = vpop.permute.xlu0 %295 }
  0x9a   :  { %v317_v33 = vmul.f32 %v312_v25, %v1294_v22  ;;  %v318_v34 = vmul.f32 %v312_v25, %v1297_v23  ;;  %v321_v37 = vmul.f32 %v312_v25, %v1300_v26  ;;  %v322_v38 = vmul.f32 %v312_v25, %v1303_v27 }
  0x9b   :  { %v301_v39 = vmul.f32 %v296_v28, %v1306_v29  ;;  %v302_v40 = vmul.f32 %v296_v28, %v1309_v30  ;;  %v305_v43 = vmul.f32 %v296_v28, %v1312_v31  ;;  %v306_v44 = vmul.f32 %v296_v28, %v1315_v32 }
  0x9d   :  { %v316_v41 = vpop.permute.xlu1 %315  ;;  %v300_v42 = vpop.permute.xlu0 %299  ;;  %v325_v59 = vadd.f32 %v317_v33, %v301_v39  ;;  %v326_v60 = vadd.f32 %v318_v34, %v302_v40  ;;  %v329_v61 = vadd.f32 %v321_v37, %v305_v43  ;;  %v330_v4 = vadd.f32 %v322_v38, %v306_v44 }
  0x9e   :  { %v319_v45 = vmul.f32 %v316_v41, %v1294_v22  ;;  %v320_v46 = vmul.f32 %v316_v41, %v1297_v23  ;;  %v323_v47 = vmul.f32 %v316_v41, %v1300_v26  ;;  %v303_v48 = vmul.f32 %v300_v42, %v1306_v29 }
  0x9f   :  { %v304_v49 = vmul.f32 %v300_v42, %v1309_v30  ;;  %v307_v50 = vmul.f32 %v300_v42, %v1312_v31  ;;  %v324_v51 = vmul.f32 %v316_v41, %v1303_v27  ;;  %v308_v52 = vmul.f32 %v300_v42, %v1315_v32 }
  0xa0   :  { %v327_v62 = vadd.f32 %v319_v45, %v303_v48 }
  0xa1   :  { %v81_v53 = vpop.permute.xlu1 %80  ;;  %v77_v54 = vpop.permute.xlu0 %76  ;;  %v328_v63 = vadd.f32 %v320_v46, %v304_v49  ;;  %v331_v5 = vadd.f32 %v323_v47, %v307_v50  ;;  %v332_v9 = vadd.f32 %v324_v51, %v308_v52 }
  0xa2   :  { %v104_v6 = vmul.f32 %v1306_v29, %v81_v53  ;;  %v105_v7 = vmul.f32 %v1309_v30, %v81_v53  ;;  %v108_v8 = vmul.f32 %v1312_v31, %v81_v53  ;;  %v109_v3 = vmul.f32 %v1315_v32, %v81_v53 }
  0xa3   :  { %v102_v10 = vmul.f32 %v1306_v29, %v77_v54  ;;  %v103_v2 = vmul.f32 %v1309_v30, %v77_v54  ;;  %v106_v11 = vmul.f32 %v1312_v31, %v77_v54  ;;  %v107_v18 = vmul.f32 %v1315_v32, %v77_v54 }
  0xa5   :  { %v122_v12 = vpop.permute.xlu1 %121  ;;  %v118_v13 = vpop.permute.xlu0 %117 }
  0xa6   :  { %v145_v14 = vmul.f32 %v1294_v22, %v122_v12  ;;  %v146_v15 = vmul.f32 %v1297_v23, %v122_v12  ;;  %v149_v16 = vmul.f32 %v1300_v26, %v122_v12  ;;  %v150_v17 = vmul.f32 %v1303_v27, %v122_v12 }
  0xa7   :  { %v143_v19 = vmul.f32 %v1294_v22, %v118_v13  ;;  %v144_v20 = vmul.f32 %v1297_v23, %v118_v13  ;;  %v147_v21 = vmul.f32 %v1300_v26, %v118_v13  ;;  %v148_v24 = vmul.f32 %v1303_v27, %v118_v13 }
  0xa8   :  { %v1361_v25 = vadd.f32 %v145_v14, %v104_v6  ;;  %v1363_v28 = vadd.f32 %v146_v15, %v105_v7  ;;  %v1365_v33 = vadd.f32 %v149_v16, %v108_v8  ;;  %v1367_v39 = vadd.f32 %v150_v17, %v109_v3 }
  0xa9   :  { %v340_v34 = vpop.permute.xlu1 %339  ;;  %v336_v35 = vpop.permute.xlu0 %335  ;;  %v151_v36 = vadd.f32 %v143_v19, %v102_v10  ;;  %v152_v37 = vadd.f32 %v144_v20, %v103_v2  ;;  %v155_v38 = vadd.f32 %v147_v21, %v106_v11  ;;  %v156_v51 = vadd.f32 %v148_v24, %v107_v18 }
  0xaa   :  { %v343_v40 = vmul.f32 %v340_v34, %v1334_v55  ;;  %v344_v41 = vmul.f32 %v340_v34, %v1337_v56  ;;  %v347_v42 = vmul.f32 %v340_v34, %v1340_v57  ;;  %v348_v43 = vmul.f32 %v340_v34, %v1343_v58 }
  0xab   :  { %v341_v44 = vmul.f32 %v336_v35, %v1334_v55  ;;  %v342_v45 = vmul.f32 %v336_v35, %v1337_v56  ;;  %v345_v46 = vmul.f32 %v336_v35, %v1340_v57  ;;  %v346_v47 = vmul.f32 %v336_v35, %v1343_v58 }
  0xac   :  { %v351_v48 = vadd.f32 %v343_v40, %v327_v62  ;;  %v352_v49 = vadd.f32 %v344_v41, %v328_v63  ;;  %v355_v50 = vadd.f32 %v347_v42, %v331_v5  ;;  %v356_v11 = vadd.f32 %v348_v43, %v332_v9 }
  0xad   :  { %v192_v52 = vpop.permute.xlu1 %191  ;;  %v188_v53 = vpop.permute.xlu0 %187  ;;  %v349_v54 = vadd.f32 %v341_v44, %v325_v59  ;;  %v350_v6 = vadd.f32 %v342_v45, %v326_v60  ;;  %v353_v7 = vadd.f32 %v345_v46, %v329_v61  ;;  %v354_v8 = vadd.f32 %v346_v47, %v330_v4 }
  0xae   :  { %v215_v3 = vmul.f32 %v1334_v55, %v192_v52  ;;  %v216_v10 = vmul.f32 %v1337_v56, %v192_v52  ;;  %v219_v2 = vmul.f32 %v1340_v57, %v192_v52  ;;  %v1381_v12 = vmul.f32 %v1343_v58, %v192_v52 }
  0xaf   :  { %v213_v62 = vmul.f32 %v1334_v55, %v188_v53  ;;  %v214_v63 = vmul.f32 %v1337_v56, %v188_v53  ;;  %v217_v5 = vmul.f32 %v1340_v57, %v188_v53  ;;  %v359_v59 = vmax.f32 %v351_v48, 0.0 }
  0xb0   :  { %v360_v60 = vmax.f32 %v352_v49, 0.0  ;;  %v357_v61 = vmax.f32 %v349_v54, 0.0  ;;  %v358_v4 = vmax.f32 %v350_v6, 0.0  ;;  %v361_v17 = vmax.f32 %v353_v7, 0.0 }
  0xb1   :  { %v613_v13 = vpop.permute.xlu1 %612  ;;  %v609_v14 = vpop.permute.xlu0 %608  ;;  %v221_v15 = vadd.f32 %v213_v62, %v151_v36  ;;  %v222_v16 = vadd.f32 %v214_v63, %v152_v37  ;;  %v362_v18 = vmax.f32 %v354_v8, 0.0  ;;  %v218_v9 = vmul.f32 %v1343_v58, %v188_v53 }
  0xb2   :  { %v1388_v19 = vmul.f32 %v613_v13, %v1306_v29  ;;  %v1391_v20 = vmul.f32 %v613_v13, %v1309_v30  ;;  %v1394_v21 = vmul.f32 %v613_v13, %v1312_v31  ;;  %v1397_v24 = vmul.f32 %v613_v13, %v1315_v32 }
  0xb3   :  { %v614_v34 = vmul.f32 %v609_v14, %v1306_v29  ;;  %v615_v35 = vmul.f32 %v609_v14, %v1309_v30  ;;  %v1402_v36 = vmul.f32 %v609_v14, %v1312_v31  ;;  %v368_v37 = vadd.f32 %v360_v60, %v359_v59 }
  0xb4   :  { %v365_v40 = vadd.f32 %v358_v4, %v357_v61  ;;  %v229_v41 = vmax.f32 %v221_v15, 0.0  ;;  %v230_v42 = vmax.f32 %v222_v16, 0.0  ;;  %v371_v45 = vadd.f32 %v362_v18, %v361_v17 }
  0xb5   :  { %v629_v43 = vpop.permute.xlu1 %628  ;;  %v625_v44 = vpop.permute.xlu0 %624  ;;  %v363_v46 = vmax.f32 %v355_v50, 0.0  ;;  %v364_v47 = vmax.f32 %v356_v11, 0.0  ;;  %v225_v48 = vadd.f32 %v217_v5, %v155_v38  ;;  %v1405_v49 = vmul.f32 %v609_v14, %v1315_v32  ;;  %369 = vadd.xlane.f32.xlu1 %v368_v37 }
  0xb6   :  { %366 = vadd.xlane.f32.xlu0 %v365_v40  ;;  %v632_v52 = vmul.f32 %v629_v43, %v1294_v22  ;;  %v633_v53 = vmul.f32 %v629_v43, %v1297_v23  ;;  %v1410_v54 = vmul.f32 %v629_v43, %v1300_v26  ;;  %v1413_v6 = vmul.f32 %v629_v43, %v1303_v27 }
  0xb7   :  { %v630_v7 = vmul.f32 %v625_v44, %v1294_v22  ;;  %v631_v50 = vmul.f32 %v625_v44, %v1297_v23  ;;  %v634_v38 = vmul.f32 %v625_v44, %v1300_v26  ;;  %v237_v8 = vadd.f32 %v230_v42, %v229_v41 }
  0xb8   :  { %v374_v11 = vadd.f32 %v364_v47, %v363_v46  ;;  %v226_v62 = vadd.f32 %v218_v9, %v156_v51  ;;  %v635_v63 = vmul.f32 %v625_v44, %v1303_v27  ;;  %v233_v60 = vmax.f32 %v225_v48, 0.0 }
  0xb9   :  { %v653_v5 = vpop.permute.xlu1 %652  ;;  %v649_v59 = vpop.permute.xlu0 %648  ;;  %v223_v61 = vadd.f32 %v215_v3, %v1361_v25  ;;  %v224_v4 = vadd.f32 %v216_v10, %v1363_v28  ;;  %238 = vadd.xlane.f32.xlu1 %v237_v8  ;;  %v227_v16 = vadd.f32 %v219_v2, %v1365_v33  ;;  %v228_v33 = vadd.f32 %v1381_v12, %v1367_v39 }
  0xba   :  { %372 = vadd.xlane.f32.xlu0 %v371_v45  ;;  %v656_v13 = vmul.f32 %v653_v5, %v1334_v55  ;;  %v657_v14 = vmul.f32 %v653_v5, %v1337_v56  ;;  %v234_v15 = vmax.f32 %v226_v62, 0.0  ;;  %v1425_v51 = vmul.f32 %v653_v5, %v1340_v57 }
  0xbb   :  { %v1428_v17 = vmul.f32 %v653_v5, %v1343_v58  ;;  %v654_v18 = vmul.f32 %v649_v59, %v1334_v55  ;;  %v655_v25 = vmul.f32 %v649_v59, %v1337_v56  ;;  %v658_v28 = vmul.f32 %v649_v59, %v1340_v57 }
  0xbc   :  { %v243_v3 = vadd.f32 %v234_v15, %v233_v60  ;;  %v231_v10 = vmax.f32 %v223_v61, 0.0  ;;  %v232_v9 = vmax.f32 %v224_v4, 0.0  ;;  %v659_v37 = vmul.f32 %v649_v59, %v1343_v58 }
  0xbd   :  { %v831_v40 = vpop.permute.xlu1 %830  ;;  %v827_v41 = vpop.permute.xlu0 %826  ;;  %v638_v2 = vadd.f32 %v630_v7, %v614_v34  ;;  %v639_v42 = vadd.f32 %v631_v50, %v615_v35  ;;  %v235_v46 = vmax.f32 %v227_v16, 0.0  ;;  %v236_v35 = vmax.f32 %v228_v33, 0.0 }
  0xbe   :  { %375 = vadd.xlane.f32.xlu0 %v374_v11  ;;  %244 = vadd.xlane.f32.xlu1 %v243_v3  ;;  %v834_v43 = vmul.f32 %v831_v40, %v1306_v29  ;;  %v835_v44 = vmul.f32 %v831_v40, %v1309_v30  ;;  %v1439_v45 = vmul.f32 %v831_v40, %v1312_v31 }
  0xbf   :  { %v1442_v47 = vmul.f32 %v831_v40, %v1315_v32  ;;  %v832_v48 = vmul.f32 %v827_v41, %v1306_v29  ;;  %v833_v8 = vmul.f32 %v827_v41, %v1309_v30  ;;  %v1447_v39 = vmul.f32 %v827_v41, %v1312_v31 }
  0xc0   :  { %v1450_v12 = vmul.f32 %v827_v41, %v1315_v32  ;;  %v240_v34 = vadd.f32 %v232_v9, %v231_v10  ;;  %v662_v7 = vadd.f32 %v654_v18, %v638_v2  ;;  %v663_v62 = vadd.f32 %v655_v25, %v639_v42 }
  0xc1   :  { %v847_v50 = vpop.permute.xlu1 %846  ;;  %v843_v11 = vpop.permute.xlu0 %842  ;;  %v640_v5 = vadd.f32 %v632_v52, %v1388_v19  ;;  %v641_v59 = vadd.f32 %v633_v53, %v1391_v20  ;;  %v642_v29 = vadd.f32 %v634_v38, %v1402_v36  ;;  %v246_v20 = vadd.f32 %v236_v35, %v235_v46 }
  0xc2   :  { %241 = vadd.xlane.f32.xlu0 %v240_v34  ;;  %v850_v30 = vmul.f32 %v847_v50, %v1294_v22  ;;  %v851_v31 = vmul.f32 %v847_v50, %v1297_v23  ;;  %v854_v32 = vmul.f32 %v847_v50, %v1300_v26  ;;  %v855_v60 = vmul.f32 %v847_v50, %v1303_v27 }
  0xc3   :  { %v848_v61 = vmul.f32 %v843_v11, %v1294_v22  ;;  %v849_v4 = vmul.f32 %v843_v11, %v1297_v23  ;;  %v852_v15 = vmul.f32 %v843_v11, %v1300_v26  ;;  %v853_v19 = vmul.f32 %v843_v11, %v1303_v27 }
  0xc4   :  { %v670_v52 = vmax.f32 %v662_v7, 0.0  ;;  %v671_v36 = vmax.f32 %v663_v62, 0.0  ;;  %v664_v53 = vadd.f32 %v656_v13, %v640_v5  ;;  %v665_v18 = vadd.f32 %v657_v14, %v641_v59 }
  0xc5   :  { %v871_v38 = vpop.permute.xlu1 %870  ;;  %v867_v16 = vpop.permute.xlu0 %866  ;;  %v643_v25 = vadd.f32 %v635_v63, %v1405_v49  ;;  %v666_v3 = vadd.f32 %v658_v28, %v642_v29  ;;  %v644_v10 = vadd.f32 %v1410_v54, %v1394_v21  ;;  %v645_v41 = vadd.f32 %v1413_v6, %v1397_v24 }
  0xc6   :  { %247 = vadd.xlane.f32.xlu0 %v246_v20  ;;  %v678_v22 = vadd.f32 %v671_v36, %v670_v52  ;;  %v874_v23 = vmul.f32 %v871_v38, %v1334_v55  ;;  %v875_v26 = vmul.f32 %v871_v38, %v1337_v56  ;;  %v878_v27 = vmul.f32 %v871_v38, %v1340_v57  ;;  %v291_v36 = vld [vmem:[#allocation7] sm:$0xff] }
  0xc7   :  { %v879_v9 = vmul.f32 %v871_v38, %v1343_v58  ;;  %v872_v13 = vmul.f32 %v867_v16, %v1334_v55  ;;  %v873_v14 = vmul.f32 %v867_v16, %v1337_v56  ;;  %v876_v49 = vmul.f32 %v867_v16, %v1340_v57 }
  0xc8   :  { %679 = vadd.xlane.f32.xlu1 %v678_v22  ;;  %v877_v63 = vmul.f32 %v867_v16, %v1343_v58  ;;  %v672_v21 = vmax.f32 %v664_v53, 0.0  ;;  %v673_v54 = vmax.f32 %v665_v18, 0.0  ;;  %v667_v28 = vadd.f32 %v659_v37, %v643_v25 }
  0xc9   :  { %v674_v40 = vmax.f32 %v666_v3, 0.0  ;;  %v668_v33 = vadd.f32 %v1425_v51, %v644_v10  ;;  %v858_v2 = vadd.f32 %v850_v30, %v834_v43  ;;  %v859_v55 = vadd.f32 %v851_v31, %v835_v44  ;;  %v414_v30 = vld [vmem:[#allocation7 + $0x18] sm:$0xff] }
  0xca   :  { %v681_v42 = vadd.f32 %v673_v54, %v672_v21  ;;  %v675_v46 = vmax.f32 %v667_v28, 0.0  ;;  %v856_v34 = vadd.f32 %v848_v61, %v832_v48  ;;  %v669_v56 = vadd.f32 %v1428_v17, %v645_v41 }
  0xcb   :  { %v676_v57 = vmax.f32 %v668_v33, 0.0  ;;  %v882_v35 = vadd.f32 %v874_v23, %v858_v2  ;;  %v857_v7 = vadd.f32 %v849_v4, %v833_v8  ;;  %v883_v50 = vadd.f32 %v875_v26, %v859_v55 }
  0xcc   :  { %682 = vadd.xlane.f32.xlu0 %v681_v42  ;;  %v684_v58 = vadd.f32 %v675_v46, %v674_v40  ;;  %v880_v37 = vadd.f32 %v872_v13, %v856_v34  ;;  %v862_v11 = vadd.f32 %v854_v32, %v1439_v45  ;;  %v677_v62 = vmax.f32 %v669_v56, 0.0 }
  0xcd   :  { %v890_v24 = vmax.f32 %v882_v35, 0.0  ;;  %v881_v6 = vadd.f32 %v873_v14, %v857_v7  ;;  %v863_v51 = vadd.f32 %v855_v60, %v1442_v47  ;;  %v891_v43 = vmax.f32 %v883_v50, 0.0  ;;  %v413_v60 = vld [vmem:[#allocation7 + $0x10] sm:$0xff] }
  0xce   :  { %685 = vadd.xlane.f32.xlu1 %v684_v58  ;;  %v888_v44 = vmax.f32 %v880_v37, 0.0  ;;  %v886_v48 = vadd.f32 %v878_v27, %v862_v11  ;;  %v860_v17 = vadd.f32 %v852_v15, %v1447_v39  ;;  %v687_v5 = vadd.f32 %v677_v62, %v676_v57  ;;  %v727_v58 = vld [vmem:[#allocation7 + $0x28] sm:$0xff] }
  0xcf   :  { %v889_v59 = vmax.f32 %v881_v6, 0.0  ;;  %v887_v8 = vadd.f32 %v879_v9, %v863_v51  ;;  %v861_v29 = vadd.f32 %v853_v19, %v1450_v12  ;;  %v899_v31 = vadd.f32 %v891_v43, %v890_v24  ;;  %v292_v19 = vld [vmem:[#allocation7 + $0x8] sm:$0xff]  ;;  %v726_v24 = vld [vmem:[#allocation7 + $0x20] sm:$0xff] }
  0xd0   :  { %v894_v61 = vmax.f32 %v886_v48, 0.0  ;;  %v884_v45 = vadd.f32 %v876_v49, %v860_v17  ;;  %688 = vadd.xlane.f32.xlu0 %v687_v5  ;;  %v1248_v47 = vmov 0.0   ;;  %v1493_v53 = vand.u32 127, %v52_v0 }
  0xd1   :  { %v896_v32 = vadd.f32 %v889_v59, %v888_v44  ;;  %v895_v4 = vmax.f32 %v887_v8, 0.0  ;;  %v885_v20 = vadd.f32 %v877_v63, %v861_v29  ;;  %1120 = vmatprep.subr.mxu0 %v1248_v47  ;;  %1124 = vmatprep.mubr.msk.f32.mxu0 %vm1249_vm0, %v1248_v47 }
  0xd2   :  { %v892_v52 = vmax.f32 %v884_v45, 0.0  ;;  %1121 = vmatpush3.msra.mxu0 %v414_v30  ;;  %1127 = vmatprep.subr.mxu1 %v1248_v47  ;;  %v267_v38 = vadd.s32 4294967288, %v1493_v53  ;;  %v1498_v10 = vsub.s32 %v1493_v53, %v1281_v1 }
  0xd3   :  { %897 = vadd.xlane.f32.xlu1 %v896_v32  ;;  %v905_v39 = vadd.f32 %v895_v4, %v894_v61  ;;  %v893_v12 = vmax.f32 %v885_v20, 0.0  ;;  %1122 = vmatprep.subr.mxu0 %v1248_v47 }
  0xd4   :  { %1123 = vmatpush3.msra.mxu0 %v413_v60  ;;  %900 = vadd.xlane.f32.xlu0 %v899_v31  ;;  %v1501_v22 = vsub.s32 %v267_v38, %v1281_v1  ;;  %v944_v38 = vld [vmem:[#allocation7 + $0x30] sm:$0xff] }
  0xd5   :  { %v902_v15 = vadd.f32 %v893_v12, %v892_v52  ;;  %1131 = vmatprep.mubr.msk.f32.mxu1 %vm1249_vm0, %v1248_v47  ;;  %1134 = vmatprep.subr.mxu0 %v1248_v47  ;;  %v945_v52 = vld [vmem:[#allocation7 + $0x38] sm:$0xff] }
  0xd6   :  { %1128 = vmatpush3.msra.mxu1 %v292_v19 }
  0xd7   :  { %903 = vadd.xlane.f32.xlu1 %v902_v15  ;;  %1129 = vmatprep.subr.mxu1 %v1248_v47 }
  0xd8   :  { %906 = vadd.xlane.f32.xlu0 %v905_v39  ;;  %1130 = vmatpush3.msra.mxu1 %v291_v36 }
  0xd9   :  { %1141 = vmatprep.subr.mxu1 %v1248_v47 }
 0x13e   :  { %v370_v16 = vpop.xlane.xlu1 %369 }
 0x13f   :  { %v367_v18 = vpop.xlane.xlu0 %366  ;;  %v378_v25 = vmul.f32 0.00390625, %v370_v16 }
 0x140   :  { %v377_v3 = vmul.f32 0.00390625, %v367_v18 }
 0x141   :  { %v382_v9 = vmul.f32 %v378_v25, %v378_v25  ;;  %v426_v0 = vrot.slane %v378_v25, %v1501_v22 }
 0x142   :  { %v239_v23 = vpop.xlane.xlu1 %238  ;;  %v381_v13 = vmul.f32 %v377_v3, %v377_v3  ;;  %v422_v14 = vrot.slane %v377_v3, %v1498_v10 }
 0x143   :  { %v373_v26 = vpop.xlane.xlu0 %372  ;;  %v396_v54 = vrot.slane %v382_v9, %v1501_v22  ;;  %v249_v42 = vmul.f32 0.00390625, %v239_v23 }
 0x144   :  { %v379_v27 = vmul.f32 0.00390625, %v373_v26  ;;  %v392_v40 = vrot.slane %v381_v13, %v1498_v10  ;;  %v427_v34 = vsel %vm272_vm1, %v426_v0, %v422_v14 }
 0x145   :  { %v253_v6 = vmul.f32 %v249_v42, %v249_v42  ;;  %v518_v59 = vrot.slane %v249_v42, %v1498_v10 }
 0x146   :  { %v383_v49 = vmul.f32 %v379_v27, %v379_v27  ;;  %v431_v41 = vrot.slane %v379_v27, %v1498_v10  ;;  %v397_v11 = vsel %vm272_vm1, %v396_v54, %v392_v40 }
 0x147   :  { %v376_v63 = vpop.xlane.xlu0 %375  ;;  %v245_v28 = vpop.xlane.xlu1 %244  ;;  %v266_v45 = vrot.slane %v253_v6, %v1498_v10 }
 0x148   :  { %v380_v21 = vmul.f32 0.00390625, %v376_v63  ;;  %v401_v46 = vrot.slane %v383_v49, %v1498_v10  ;;  %v251_v57 = vmul.f32 0.00390625, %v245_v28 }
 0x14a   :  { %v384_v33 = vmul.f32 %v380_v21, %v380_v21  ;;  %v435_v2 = vrot.slane %v380_v21, %v1501_v22  ;;  %v255_v44 = vmul.f32 %v251_v57, %v251_v57  ;;  %v527_v29 = vrot.slane %v251_v57, %v1498_v10 }
 0x14b   :  { %v242_v55 = vpop.xlane.xlu0 %241 }
 0x14c   :  { %v405_v56 = vrot.slane %v384_v33, %v1501_v22  ;;  %v250_v35 = vmul.f32 0.00390625, %v242_v55  ;;  %v436_v7 = vsel %vm272_vm1, %v435_v2, %v431_v41  ;;  %v277_v32 = vrot.slane %v255_v44, %v1498_v10 }
 0x14d   :  { %v437_v50 = vsel %vm283_vm2, %v436_v7, %v427_v34 }
 0x14e   :  { %v254_v37 = vmul.f32 %v250_v35, %v250_v35  ;;  %1125 = vmatmul.mubr.msk.f32.vlgmr.msra.gmra.mxu0 %vm438_vm3, %v437_v50  ;;  %v406_v62 = vsel %vm272_vm1, %v405_v56, %v401_v46  ;;  %v522_v48 = vrot.slane %v250_v35, %v1501_v22 }
 0x14f   :  { %v248_v51 = vpop.xlane.xlu0 %247  ;;  %v407_v43 = vsel %vm283_vm2, %v406_v62, %v397_v11  ;;  %1135 = vmatpush3.msra.mxu0 %v727_v58  ;;  %1138 = vmatprep.mubr.msk.f32.mxu0 %vm1249_vm0, %v1248_v47 }
 0x150   :  { %v252_v17 = vmul.f32 0.00390625, %v248_v51  ;;  %v409_v5 = vsel %vm286_vm4, %v407_v43, 0.0  ;;  %1136 = vmatprep.subr.mxu0 %v1248_v47  ;;  %v271_v30 = vrot.slane %v254_v37, %v1501_v22  ;;  %v523_v20 = vsel %vm272_vm1, %v522_v48, %v518_v59 }
 0x151   :  { %v680_v8 = vpop.xlane.xlu1 %679  ;;  %410 = vadd.xlane.f32.xlu0 %v409_v5  ;;  %1137 = vmatpush3.msra.mxu0 %v726_v24 }
 0x152   :  { %v256_v31 = vmul.f32 %v252_v17, %v252_v17  ;;  %v531_v61 = vrot.slane %v252_v17, %v1501_v22  ;;  %v273_v19 = vsel %vm272_vm1, %v271_v30, %v266_v45  ;;  %v690_v25 = vmul.f32 0.00390625, %v680_v8 }
 0x154   :  { %v281_v4 = vrot.slane %v256_v31, %v1501_v22  ;;  %v532_v60 = vsel %vm272_vm1, %v531_v61, %v527_v29  ;;  %v694_v0 = vmul.f32 %v690_v25, %v690_v25  ;;  %v735_v14 = vrot.slane %v690_v25, %v1498_v10 }
 0x155   :  { %v683_v39 = vpop.xlane.xlu0 %682  ;;  %v533_v12 = vsel %vm283_vm2, %v532_v60, %v523_v20 }
 0x156   :  { %v691_v15 = vmul.f32 0.00390625, %v683_v39  ;;  %1132 = vmatmul.mubr.msk.f32.vlgmr.msra.gmra.mxu1 %vm438_vm3, %v533_v12  ;;  %v282_v36 = vsel %vm272_vm1, %v281_v4, %v277_v32  ;;  %v705_v55 = vrot.slane %v694_v0, %v1498_v10 }
 0x157   :  { %v686_v16 = vpop.xlane.xlu1 %685  ;;  %v284_v18 = vsel %vm283_vm2, %v282_v36, %v273_v19  ;;  %1142 = vmatpush3.msra.mxu1 %v945_v52  ;;  %1145 = vmatprep.mubr.msk.f32.mxu1 %vm1249_vm0, %v1248_v47 }
 0x158   :  { %v692_v3 = vmul.f32 0.00390625, %v686_v16  ;;  %v287_v23 = vsel %vm286_vm4, %v284_v18, 0.0  ;;  %1143 = vmatprep.subr.mxu1 %v1248_v47  ;;  %v695_v26 = vmul.f32 %v691_v15, %v691_v15  ;;  %v739_v9 = vrot.slane %v691_v15, %v1501_v22 }
 0x159   :  { %288 = vadd.xlane.f32.xlu1 %v287_v23  ;;  %1144 = vmatpush3.msra.mxu1 %v944_v38  ;;  %v689_v27 = vpop.xlane.xlu0 %688 }
 0x15a   :  { %v693_v13 = vmul.f32 0.00390625, %v689_v27  ;;  %v696_v49 = vmul.f32 %v692_v3, %v692_v3  ;;  %v744_v21 = vrot.slane %v692_v3, %v1498_v10  ;;  %v709_v47 = vrot.slane %v695_v26, %v1501_v22 }
 0x15b   :  { %v740_v33 = vsel %vm272_vm1, %v739_v9, %v735_v14 }
 0x15c   :  { %v898_v63 = vpop.xlane.xlu1 %897  ;;  %v697_v54 = vmul.f32 %v693_v13, %v693_v13  ;;  %v748_v28 = vrot.slane %v693_v13, %v1501_v22  ;;  %v714_v34 = vrot.slane %v696_v49, %v1498_v10  ;;  %v710_v37 = vsel %vm272_vm1, %v709_v47, %v705_v55 }
 0x15d   :  { %v908_v40 = vmul.f32 0.00390625, %v898_v63  ;;  %v901_v41 = vpop.xlane.xlu0 %900 }
 0x15e   :  { %v718_v2 = vrot.slane %v697_v54, %v1501_v22  ;;  %v749_v42 = vsel %vm272_vm1, %v748_v28, %v744_v21  ;;  %v909_v46 = vmul.f32 0.00390625, %v901_v41 }
 0x15f   :  { %v912_v56 = vmul.f32 %v908_v40, %v908_v40  ;;  %v750_v57 = vsel %vm283_vm2, %v749_v42, %v740_v33  ;;  %v953_v24 = vrot.slane %v908_v40, %v1498_v10  ;;  %v1075_v42 = vstv %s1074_s1 }
 0x160   :  { %v904_v35 = vpop.xlane.xlu1 %903  ;;  %v913_v7 = vmul.f32 %v909_v46, %v909_v46  ;;  %1139 = vmatmul.mubr.msk.f32.vlgmr.msra.gmra.mxu0 %vm438_vm3, %v750_v57  ;;  %v719_v11 = vsel %vm272_vm1, %v718_v2, %v714_v34  ;;  %v957_v62 = vrot.slane %v909_v46, %v1501_v22  ;;  %v1076_v34 = vsel %vm1073_vm7, %v1075_v42, 0 }
 0x161   :  { %v910_v58 = vmul.f32 0.00390625, %v904_v35  ;;  %v907_v50 = vpop.xlane.xlu0 %906  ;;  %v923_v44 = vrot.slane %v912_v56, %v1498_v10  ;;  %v720_v17 = vsel %vm283_vm2, %v719_v11, %v710_v37  ;;  %v1079_v56 = vstv %s1107_s2 }
 0x162   :  { %v911_v6 = vmul.f32 0.00390625, %v907_v50  ;;  %v927_v43 = vrot.slane %v913_v7, %v1501_v22  ;;  %v722_v29 = vsel %vm286_vm4, %v720_v17, 0.0  ;;  %v958_v30 = vsel %vm272_vm1, %v957_v62, %v953_v24 }
 0x163   :  { %v914_v51 = vmul.f32 %v910_v58, %v910_v58  ;;  %v962_v48 = vrot.slane %v910_v58, %v1498_v10  ;;  %723 = vadd.xlane.f32.xlu1 %v722_v29  ;;  %v1080_v58 = vsel %vm1077_vm8, %v1079_v56, %v1076_v34 }
 0x164   :  { %v915_v5 = vmul.f32 %v911_v6, %v911_v6  ;;  %v966_v59 = vrot.slane %v911_v6, %v1501_v22  ;;  %v928_v32 = vsel %vm272_vm1, %v927_v43, %v923_v44  ;;  %vm1081_vm11 = vcmp.eq.s32.totalorder %v1493_v53, %v1080_v58 }
 0x165   :  { %v932_v8 = vrot.slane %v914_v51, %v1498_v10 }
 0x166   :  { %v936_v31 = vrot.slane %v915_v5, %v1501_v22  ;;  %v967_v61 = vsel %vm272_vm1, %v966_v59, %v962_v48 }
 0x167   :  { %v968_v45 = vsel %vm283_vm2, %v967_v61, %v958_v30 }
 0x168   :  { %1146 = vmatmul.mubr.msk.f32.vlgmr.msra.gmra.mxu1 %vm438_vm3, %v968_v45  ;;  %v937_v4 = vsel %vm272_vm1, %v936_v31, %v932_v8 }
 0x169   :  { %v938_v20 = vsel %vm283_vm2, %v937_v4, %v928_v32 }
 0x16a   :  { %v940_v10 = vsel %vm286_vm4, %v938_v20, 0.0 }
 0x16b   :  { %941 = vadd.xlane.f32.xlu0 %v940_v10 }
 0x1da   :  { %v411_v52 = vpop.xlane.xlu0 %410 }
 0x1e2   :  { %v289_v60 = vpop.xlane.xlu1 %288 }
 0x1e3   :  { %v412_v12 = vadd.f32 %v411_v52, %v289_v60 }
 0x1ec   :  { %v724_v39 = vpop.xlane.xlu1 %723 }
 0x1ed   :  { %v725_v15 = vadd.f32 %v724_v39, %v412_v12 }
 0x1f4   :  { %v942_v22 = vpop.xlane.xlu0 %941 }
 0x1f5   :  { %v943_v19 = vadd.f32 %v942_v22, %v725_v15 }
 0x1f7   :  { %1160 = vrsqrt.f32 %v943_v19  ;;  %vm1044_vm5 = vcmp.eq.f32.partialorder %v943_v19, inf  ;;  %v1047_v3 = vand.u32 2147483648, %v943_v19  ;;  %vm1046_vm6 = vcmp.eq.f32.partialorder %v943_v19, 0.0 }
 0x204   :  { %v1161_v36 = vpop.eup %1160 }
 0x205   :  { %v1043_v16 = vmul.f32 %v1161_v36, %v943_v19 }
 0x207   :  { %v1045_v25 = vsel %vm1044_vm5, %v943_v19, %v1043_v16 }
 0x208   :  { %v1048_v26 = vsel %vm1046_vm6, %v1047_v3, %v1045_v25 }
 0x209   :  { %v1049_v9 = vmax.f32 %v1048_v26, 1e-12 }
 0x20b   :  { %1162 = vrcp.f32 %v1049_v9 }
 0x20e   :  { %v507_v38 = vpop.f32.mrf.mxu0 }
 0x210   :  { %v1126_v18 = vpop.f32.mrf.mxu0 }
 0x216   :  { %v602_v23 = vpop.f32.mrf.mxu1 }
 0x217   :  { %v603_v14 = vadd.f32 %v602_v23, %v507_v38 }
 0x218   :  { %v1133_v27 = vpop.f32.mrf.mxu1  ;;  %v1163_v54 = vpop.eup %1162 }
 0x220   :  { %v819_v13 = vpop.f32.mrf.mxu0 }
 0x221   :  { %v823_v49 = vadd.f32 %v819_v13, %v603_v14 }
 0x222   :  { %v1140_v0 = vpop.f32.mrf.mxu0 }
 0x228   :  { %v1037_v63 = vpop.f32.mrf.mxu1 }
 0x229   :  { %v1041_v21 = vadd.f32 %v1037_v63, %v823_v49 }
 0x22a   :  { %v1147_v28 = vpop.f32.mrf.mxu1 }
 0x22b   :  { %v1052_v40 = vmul.f32 %v1163_v54, %v1041_v21 }
 0x22d   :  { %v1105_v47 = vclamps-f32 %v1052_v40, 1.0 }
 0x22f   :  { %v1055_v41 = vmul.f32 %v1105_v47, %v1105_v47  ;;  %v1066_v50 = vmul.f32 0.87758255, %v1105_v47  ;;  %v1106_v62 = vadd.f32 -0.23971277, %v1105_v47  ;;  %vm1065_vm12 = vcmp.gt.f32.partialorder %v1105_v47, -0.87758255 }
 0x231   :  { %v1056_v33 = vsub.f32 1.0, %v1055_v41 }
 0x233   :  { %v1057_v2 = vmax.f32 %v1056_v33, 0.0 }
 0x235   :  { %1164 = vrsqrt.f32 %v1057_v2  ;;  %vm1060_vm9 = vcmp.eq.f32.partialorder %v1057_v2, inf  ;;  %v1063_v57 = vand.u32 2147483648, %v1057_v2  ;;  %vm1062_vm10 = vcmp.eq.f32.partialorder %v1057_v2, 0.0 }
 0x242   :  { %v1165_v46 = vpop.eup %1164 }
 0x243   :  { %v1059_v55 = vmul.f32 %v1165_v46, %v1057_v2 }
 0x245   :  { %v1061_v35 = vsel %vm1060_vm9, %v1057_v2, %v1059_v55 }
 0x246   :  { %v1064_v7 = vsel %vm1062_vm10, %v1063_v57, %v1061_v35 }
 0x247   :  { %v1067_v37 = vmul.f32 0.47942555, %v1064_v7 }
 0x249   :  { %v1068_v11 = vsub.f32 %v1066_v50, %v1067_v37 }
 0x24b   :  { %v1070_v24 = vsel %vm1065_vm12, %v1068_v11, %v1106_v62 }
 0x24c   :  { %v1082_v6 = vsel %vm1081_vm11, %v1070_v24, %v1105_v47 }
 0x24d   :  { %v1083_v51 = vmul.f32 30.0, %v1082_v6 }
 0x24f   :  { %1084 = vst [vmem:[#allocation9] sm:$0x3] %v1083_v51 }
 0x250   :  { %1225 = shalt.err (!%p1222_p0)
}
 0x251   :  { %1094 = dma.vmem_to_hbm [thread:$0]  %s1092_s27, 32, %s1582_s3, [#allocation6]  }
 0x252   :  { %1240 = dma.done.wait [#allocation6], 32  }
 0x253   :  { %1241 = vsyncadd [#allocation6], 4294967264 }
 0x254   :  { %1098 = vsyncpa [#allocation5], 1 }
 0x255   :  { %1099 = vsyncpa [#allocation8], 1 }
 0x256   :  { %1100 = vsyncpa [#allocation6], 1 }

</bundles_post_ra>
